<compile_context>
chip_gen: v7x
topology: tpu7x:2x2x1
jax: 0.10.0
libtpu: 0.0.40
codegen_flags: <defaults>
</compile_context>

<pallas_src>
import functools

import jax
import jax.numpy as jnp
from jax import lax
from jax.experimental import pallas as pl
from jax.experimental.pallas import tpu as pltpu


# ---------------------------------------------------------------------------
# Kernels
# ---------------------------------------------------------------------------
def _layernorm_rowwise_kernel(z_ref, a_ref, b_ref, o_ref, *, d_hid: int, eps: float):
    """General path: one logical row per vreg row (d_hid on the lane axis)."""
    z = z_ref[...].astype(jnp.float32)                    # (tile_rows, d_hid)

    mu = jnp.mean(z, axis=-1, keepdims=True)
    diff = z - mu
    # torch.std default: unbiased estimator (divide by N-1).
    var = jnp.sum(diff * diff, axis=-1, keepdims=True) * jnp.float32(
        1.0 / (d_hid - 1)
    )
    sigma = jnp.sqrt(var)

    # One reciprocal per row ((tile_rows, 1) column) + broadcast multiply.
    # approx=False keeps results within the 1e-5 test tolerance.
    inv = pl.reciprocal(sigma + jnp.float32(eps), approx=False)

    o_ref[...] = (diff * inv * a_ref[...] + b_ref[...]).astype(o_ref.dtype)


def _layernorm_packed_kernel(z_ref, a_ref, b_ref, s_ref, o_ref, *, d_hid: int,
                             eps: float):
    """Lane-dense path for d_hid < 128: 128//d_hid logical rows per vreg row.

    s_ref is a (128, 128) block-diagonal ones matrix: x @ s computes each
    segment's (= each logical row's) sum and broadcasts it back across that
    segment's lanes in a single MXU op, so HBM loads/stores stay full-width.
    """
    x = z_ref[...].astype(jnp.float32)                    # (tile_rows, 128)
    s = s_ref[...]                                        # (128, 128) float32

    seg_sum = jnp.dot(x, s, preferred_element_type=jnp.float32,
                      precision=lax.Precision.HIGHEST)
    mu = seg_sum * jnp.float32(1.0 / d_hid)
    diff = x - mu
    seg_sq = jnp.dot(diff * diff, s, preferred_element_type=jnp.float32,
                     precision=lax.Precision.HIGHEST)
    var = seg_sq * jnp.float32(1.0 / (d_hid - 1))         # unbiased (N-1)
    sigma = jnp.sqrt(var)

    inv = pl.reciprocal(sigma + jnp.float32(eps), approx=False)
    o_ref[...] = (diff * inv * a_ref[...] + b_ref[...]).astype(o_ref.dtype)


# ---------------------------------------------------------------------------
# Tiling / VMEM budget helpers
# ---------------------------------------------------------------------------
def _vmem_limit_bytes() -> int:
    """Scoped-VMEM request: physical capacity minus headroom, capped at 64 MiB."""
    cap = 128 * 1024 * 1024
    try:  # 64 MiB per TC on v7x, 128 MiB on v5e/v6e.
        cap = int(getattr(pltpu.get_tpu_info(), "vmem_capacity_bytes", cap))
    except Exception:
        pass
    # v5e/v6e -> 64 MiB scoped; v7x -> 48 MiB (16 MiB headroom under physical).
    return max(16 * 1024 * 1024, min(cap - 16 * 1024 * 1024, 64 * 1024 * 1024))


def _pick_tile_rows(rows: int, row_width: int, dtype_size: int,
                    vmem_limit: int) -> int:
    """Row tile: sublane-aligned, footprint-budgeted, >=4 grid steps, even grid."""
    sublane = {4: 8, 2: 16, 1: 32}.get(dtype_size, 8)
    if rows <= sublane:
        return rows  # single block equal to the full array: always legal.

    io_bytes = row_width * dtype_size
    # Per-row block footprint: double-buffered input + output (io dtype) plus
    # ~4 float32 temporaries created in the kernel body.
    footprint = 4 * io_bytes + 4 * row_width * 4
    budget_rows = max(sublane, (vmem_limit // 2) // footprint)
    target_rows = max(sublane, (4 * 1024 * 1024) // max(1, io_bytes))  # ~4 MiB in

    # Keep >= 4 grid steps when rows allow it (2 blocks per TensorCore on v7x,
    # so each core still double-buffers after megacore sharding).
    t = min(target_rows, budget_rows, max(sublane, pl.cdiv(rows, 4)))
    t = max(sublane, (t // sublane) * sublane)
    if t >= rows:
        return rows

    # Best effort: even grid count so the two v7x TensorCores stay balanced.
    g = pl.cdiv(rows, t)
    if g > 1 and g % 2 == 1:
        t_even = pl.cdiv(pl.cdiv(rows, g + 1), sublane) * sublane
        if t_even >= sublane and pl.cdiv(rows, t_even) % 2 == 0:
            t = t_even
    return t


# ---------------------------------------------------------------------------
# Wrapper
# ---------------------------------------------------------------------------
def layer_norm(z, a_2, b_2, eps: float = 0.001):
    """Apply OpenNMT-style LayerNorm over the last axis of `z`."""
    d_hid = z.shape[-1]
    if d_hid == 1:
        # Reference module returns the input untouched when size(-1) == 1.
        # (Also protects the 1/(d_hid-1) unbiased-variance factor.)
        return z

    orig_shape = z.shape
    rows = 1
    for s in orig_shape[:-1]:
        rows *= s

    dtype_size = jnp.dtype(z.dtype).itemsize
    vmem_limit = _vmem_limit_bytes()

    a2d = a_2.reshape(1, d_hid).astype(jnp.float32)
    b2d = b_2.reshape(1, d_hid).astype(jnp.float32)

    pack = 128 // d_hid if (d_hid < 128 and 128 % d_hid == 0) else 0
    # Lane-dense path only when the packed layout needs no padding and fills
    # at least one full sublane tile of packed rows (always true at production
    # row counts; tiny inputs fall back to the simple row-wise path).
    packable = pack > 0 and rows % pack == 0 and (rows // pack) >= 8

    if packable:
        rows_p = rows // pack
        z2d = z.reshape(rows_p, 128)                      # lane-dense slab
        a_pk = jnp.tile(a2d, (1, pack))                   # (1, 128)
        b_pk = jnp.tile(b2d, (1, pack))                   # (1, 128)
        seg = jnp.arange(128, dtype=jnp.int32) // d_hid
        seg_mat = (seg[:, None] == seg[None, :]).astype(jnp.float32)  # (128,128)

        tile = _pick_tile_rows(rows_p, 128, dtype_size, vmem_limit)
        grid = (pl.cdiv(rows_p, tile),)
        kernel = functools.partial(_layernorm_packed_kernel, d_hid=d_hid, eps=eps)

        cost = pl.CostEstimate(
            flops=4 * rows_p * 128 * 128 + 8 * rows * d_hid,
            transcendentals=2 * rows_p * 128,
            bytes_accessed=2 * rows * d_hid * dtype_size + (2 * 128 + 128 * 128) * 4,
        )

        out2d = pl.pallas_call(
            kernel,
            out_shape=jax.ShapeDtypeStruct((rows_p, 128), z.dtype),
            grid_spec=pltpu.PrefetchScalarGridSpec(
                num_scalar_prefetch=0,
                grid=grid,
                in_specs=[
                    pl.BlockSpec((tile, 128), lambda i: (i, 0)),
                    pl.BlockSpec((1, 128), lambda i: (0, 0)),
                    pl.BlockSpec((1, 128), lambda i: (0, 0)),
                    pl.BlockSpec((128, 128), lambda i: (0, 0)),
                ],
                out_specs=pl.BlockSpec((tile, 128), lambda i: (i, 0)),
            ),
            compiler_params=pltpu.CompilerParams(
                dimension_semantics=("parallel",),
                vmem_limit_bytes=vmem_limit,
            ),
            cost_estimate=cost,
        )(z2d, a_pk, b_pk, seg_mat)
        return out2d.reshape(orig_shape)

    # ---------------- general row-wise path (d_hid >= 128 or not packable) ----
    z2d = z.reshape(rows, d_hid)
    tile = _pick_tile_rows(rows, d_hid, dtype_size, vmem_limit)
    grid = (pl.cdiv(rows, tile),)   # trailing partial block clipped by Pallas
    kernel = functools.partial(_layernorm_rowwise_kernel, d_hid=d_hid, eps=eps)

    cost = pl.CostEstimate(
        flops=8 * rows * d_hid,
        transcendentals=2 * rows,                         # sqrt + recip per row
        bytes_accessed=2 * rows * d_hid * dtype_size + 2 * d_hid * 4,
    )

    out2d = pl.pallas_call(
        kernel,
        out_shape=jax.ShapeDtypeStruct((rows, d_hid), z.dtype),
        grid_spec=pltpu.PrefetchScalarGridSpec(
            num_scalar_prefetch=0,
            grid=grid,
            in_specs=[
                pl.BlockSpec((tile, d_hid), lambda i: (i, 0)),
                pl.BlockSpec((1, d_hid), lambda i: (0, 0)),
                pl.BlockSpec((1, d_hid), lambda i: (0, 0)),
            ],
            out_specs=pl.BlockSpec((tile, d_hid), lambda i: (i, 0)),
        ),
        compiler_params=pltpu.CompilerParams(
            dimension_semantics=("parallel",),
            vmem_limit_bytes=vmem_limit,
        ),
        cost_estimate=cost,
    )(z2d, a2d, b2d)
    return out2d.reshape(orig_shape)


# ---------------------------------------------------------------------------
# Pure-JAX reference (mirrors the PyTorch module)
# ---------------------------------------------------------------------------
def _reference(z, a_2, b_2, eps=0.001):
    if z.shape[-1] == 1:
        return z
    mu = jnp.mean(z, axis=-1, keepdims=True)
    var = jnp.sum((z - mu) ** 2, axis=-1, keepdims=True) / (z.shape[-1] - 1)
    sigma = jnp.sqrt(var)
    return (z - mu) / (sigma + eps) * a_2 + b_2


if __name__ == "__main__":
    key = jax.random.PRNGKey(0)

    # Deterministic parameter init matching the module's __init__:
    #   a_2 = ones(d_hid), b_2 = zeros(d_hid)
    def params(d):
        return jnp.ones((d,), jnp.float32), jnp.zeros((d,), jnp.float32)

    k1, k2, k3 = jax.random.split(key, 3)

    # 1) Spec shape (batch=2, seq=8, d_hid=32): small d_hid, row-wise path.
    d1 = 32
    a1, b1 = params(d1)
    z1 = jax.random.normal(k1, (2, 8, d1), dtype=jnp.float32)
    o1 = jax.block_until_ready(layer_norm(z1, a1, b1, eps=0.001))
    assert o1.shape == z1.shape and o1.dtype == z1.dtype
    assert jnp.allclose(o1, _reference(z1, a1, b1), atol=1e-5, rtol=1e-5)

    # 2) Small d_hid with enough rows to take the lane-dense packed path.
    d2 = 32
    a2, b2 = params(d2)
    z2 = jax.random.normal(k2, (2, 16, d2), dtype=jnp.float32)
    o2 = jax.block_until_ready(layer_norm(z2, a2, b2, eps=0.001))
    assert o2.shape == z2.shape and o2.dtype == z2.dtype
    assert jnp.allclose(o2, _reference(z2, a2, b2), atol=1e-5, rtol=1e-5)

    # 3) Wide hidden with rows % tile != 0: exercises the clipped trailing block.
    d3 = 256
    a3, b3 = params(d3)
    z3 = jax.random.normal(k3, (3, 5, d3), dtype=jnp.float32)
    o3 = jax.block_until_ready(layer_norm(z3, a3, b3, eps=0.001))
    assert o3.shape == z3.shape and o3.dtype == z3.dtype
    assert jnp.allclose(o3, _reference(z3, a3, b3), atol=1e-5, rtol=1e-5)

    print("KERNEL_OK")
</pallas_src>

<mosaic_0001>
module attributes {stable_mosaic.version = 11 : i64} {
  func.func @_layernorm_rowwise_kernel(%arg0: i32, %arg1: memref<8x32xf32, #tpu.memory_space<vmem>>, %arg2: memref<1x32xf32, #tpu.memory_space<vmem>>, %arg3: memref<1x32xf32, #tpu.memory_space<vmem>>, %arg4: memref<8x32xf32, #tpu.memory_space<vmem>>) attributes {dimension_semantics = [#tpu.dimension_semantics<parallel>], iteration_bounds = array<i64: 2>, scalar_prefetch = 0 : i64, scratch_operands = 0 : i64, tpu.core_type = #tpu.core_type<tc>, window_params = [{transform_indices = @transform_0, window_bounds = array<i64: 8, 32>}, {pipeline_mode = #tpu.pipeline_mode<synchronous>, transform_indices = @transform_1, window_bounds = array<i64: 1, 32>}, {pipeline_mode = #tpu.pipeline_mode<synchronous>, transform_indices = @transform_2, window_bounds = array<i64: 1, 32>}, {transform_indices = @transform_3, window_bounds = array<i64: 8, 32>}]} {
    %c0 = arith.constant 0 : index
    %c0_0 = arith.constant 0 : index
    %0 = vector.load %arg1[%c0, %c0_0] : memref<8x32xf32, #tpu.memory_space<vmem>>, vector<8x32xf32>
    %cst = arith.constant dense<0.000000e+00> : vector<8xf32>
    %1 = vector.multi_reduction <add>, %0, %cst [1] : vector<8x32xf32> to vector<8xf32>
    %2 = vector.shape_cast %1 : vector<8xf32> to vector<8x1xf32>
    %cst_1 = arith.constant 3.200000e+01 : f32
    %3 = vector.broadcast %cst_1 : f32 to vector<8x1xf32>
    %4 = arith.divf %2, %3 : vector<8x1xf32>
    %5 = vector.broadcast %4 : vector<8x1xf32> to vector<8x32xf32>
    %6 = arith.subf %0, %5 : vector<8x32xf32>
    %7 = arith.mulf %6, %6 : vector<8x32xf32>
    %cst_2 = arith.constant dense<0.000000e+00> : vector<8xf32>
    %8 = vector.multi_reduction <add>, %7, %cst_2 [1] : vector<8x32xf32> to vector<8xf32>
    %9 = vector.shape_cast %8 : vector<8xf32> to vector<8x1xf32>
    %cst_3 = arith.constant 0.0322580636 : f32
    %10 = vector.broadcast %cst_3 : f32 to vector<8x1xf32>
    %11 = arith.mulf %9, %10 : vector<8x1xf32>
    %12 = math.sqrt %11 : vector<8x1xf32>
    %cst_4 = arith.constant 1.000000e-03 : f32
    %13 = vector.broadcast %cst_4 : f32 to vector<8x1xf32>
    %14 = arith.addf %12, %13 : vector<8x1xf32>
    %15 = tpu.reciprocal %14 : vector<8x1xf32> -> vector<8x1xf32>
    %16 = vector.broadcast %15 : vector<8x1xf32> to vector<8x32xf32>
    %17 = arith.mulf %6, %16 : vector<8x32xf32>
    %c0_5 = arith.constant 0 : index
    %c0_6 = arith.constant 0 : index
    %18 = vector.load %arg2[%c0_5, %c0_6] : memref<1x32xf32, #tpu.memory_space<vmem>>, vector<1x32xf32>
    %19 = vector.broadcast %18 : vector<1x32xf32> to vector<8x32xf32>
    %20 = arith.mulf %17, %19 : vector<8x32xf32>
    %c0_7 = arith.constant 0 : index
    %c0_8 = arith.constant 0 : index
    %21 = vector.load %arg3[%c0_7, %c0_8] : memref<1x32xf32, #tpu.memory_space<vmem>>, vector<1x32xf32>
    %22 = vector.broadcast %21 : vector<1x32xf32> to vector<8x32xf32>
    %23 = arith.addf %20, %22 : vector<8x32xf32>
    %c0_9 = arith.constant 0 : index
    %c0_10 = arith.constant 0 : index
    %24 = vector.load %arg4[%c0_9, %c0_10] : memref<8x32xf32, #tpu.memory_space<vmem>>, vector<8x32xf32>
    tpu.vector_store %arg4[%c0_9, %c0_10], %23 {strides = array<i32>} : memref<8x32xf32, #tpu.memory_space<vmem>>, vector<8x32xf32>,
    return
  }
  func.func @transform_0(%arg0: i32) -> (i32, i32) {
    %c0_i32 = arith.constant 0 : i32
    %c0_i32_0 = arith.constant 0 : i32
    return %arg0, %c0_i32 : i32, i32
  }
  func.func @transform_1(%arg0: i32) -> (i32, i32) {
    %c0_i32 = arith.constant 0 : i32
    %c0_i32_0 = arith.constant 0 : i32
    %c0_i32_1 = arith.constant 0 : i32
    return %c0_i32, %c0_i32_0 : i32, i32
  }
  func.func @transform_2(%arg0: i32) -> (i32, i32) {
    %c0_i32 = arith.constant 0 : i32
    %c0_i32_0 = arith.constant 0 : i32
    %c0_i32_1 = arith.constant 0 : i32
    return %c0_i32, %c0_i32_0 : i32, i32
  }
  func.func @transform_3(%arg0: i32) -> (i32, i32) {
    %c0_i32 = arith.constant 0 : i32
    %c0_i32_0 = arith.constant 0 : i32
    return %arg0, %c0_i32 : i32, i32
  }
}

</mosaic_0001>

<bundles_post_ra>
// kernel: tpu_custom_call.1
= control target key start
LH: loop header
LB: loop body
LE: loop exit
PB: predicated region body
PF: predicated region fallthrough
CT: control target
= control target key end

     0   :  { %8 = vsyncpa [#allocation3], 0  ;;  %s858_s0 = inlined_call_operand.hbm [shape: f32[16,32], index: 0, kind: input, shape index: {}]   ;;  %s859_s1 = inlined_call_operand.hbm [shape: f32[1,32], index: 1, kind: input, shape index: {}]   ;;  %s860_s2 = inlined_call_operand.hbm [shape: f32[1,32], index: 2, kind: input, shape index: {}]   ;;  %s861_s3 = inlined_call_operand.hbm [shape: f32[16,32], index: 3, kind: output, shape index: {}]  }
   0x1   :  { %10 = vsyncpa [#allocation3 + $0x1], 0 }
   0x2   :  { %11 = vsyncpa [#allocation6], 0 }
   0x3   :  { %12 = vsyncpa [#allocation4], 0 }
   0x4   :  { %14 = vsyncpa [#allocation4 + $0x1], 0  ;;  %s625_s12 = smov 0   ;;  %s627_s13 = smov 0  }
   0x5   :  { %s629_s14 = smov 0   ;;  %s631_s15 = smov 0  }
   0x6 LB: > { %s646_s16 = sadd.s32 4294967295, %s599_s15   ;;  %s354_s17 = sadd.s32 4294967294, %s599_s15   ;;  %s599_s15 = sphi %s631_s15, %s881_s15   ;;  %s595_s14 = sphi %s629_s14, %s880_s14   ;;  %s591_s13 = sphi %s627_s13, %s879_s13   ;;  %s587_s12 = sphi %s625_s12, %s878_s12  }
   0x7   : > { %p40_p0 = scmp.ne.s32.totalorder %s591_s13, %s587_s12  ;;  %p862_p1 = scmp.eq.s32.totalorder %s646_s16, 0 }
   0x8   : > { %p112_p3 = scmp.eq.s32.totalorder %s354_s17, 1  ;;  %p355_p5 = scmp.ge.s32.totalorder %s599_s15, 1 }
   0x9   : > { %p655_p4 = por %p862_p1, %p40_p0  ;;  %p119_p7 = scmp.lt.s32.totalorder %s599_s15, 3 }
   0xa   : > { %p660_p6 = por %p112_p3, %p40_p0  ;;  %s601_s21 = smov [#allocation5]  }
   0xb   : > { %s865_s18 = scalar_select %p655_p4, 1, 0 }
   0xc   : > { %s866_s19 = scalar_select %p660_p6, 1, 0 }
   0xd   : > { %p665_p8 = pnand %p355_p5, %p119_p7  ;;  %s132_s22 = sshll.u32 %s601_s21, 4  ;;  %s133_s22 = int_to_ptr.vmem [resolvable:$true] %s132_s22 }
   0xe   : > { %s602_s23 = smov [#allocation7]   ;;  %s681_s26 = sadd.s32 1, %s599_s15  }
   0xf   : > { %s867_s20 = scalar_select %p665_p8, 1, 0 }
  0x10   : > { %p384_p10 = pneg %p665_p8  ;;  %s143_s24 = sshll.u32 %s602_s23, 4  ;;  %s678_s24 = int_to_ptr.vmem [resolvable:$true] %s143_s24 }
  0x11   : > { %s24_s27 = ssub.s32 %s599_s15, %s681_s26  ;;  %s443_s30 = scalar_lea.hbm %s859_s1, 16 }
  0x12   : > { %p674_p11 = pnand %p384_p10, %p862_p1  ;;  %p444_p12 = scmp.ne.s32.totalorder %s859_s1, %s443_s30 }
  0x13   : > { %p450_p5 = scmp.lt.u32.totalorder %s443_s30, %s859_s1 }
  0x14   : > { %p445_p13 = pneg %p674_p11 }
  0x16   : > { %p446_p0 = pnand %p445_p13, %p444_p12 }
  0x18   : > { %p447_p3 = pneg %p446_p0 }
  0x1a   : > { %p452_p7 = pnand %p450_p5, %p447_p3 }
  0x1c   : > { %455 = shalt.err (!%p452_p7)
}
  0x1d   : > { %s456_s8 = scalar_lea.vmem %s133_s22, 16  ;;  %s463_s9 = scalar_lea.vmem %s133_s22, 32 }
  0x1e   : > { %p457_p10 = scmp.ne.s32.totalorder %s133_s22, %s456_s8  ;;  %p464_p2 = scmp.lt.s32.totalorder %s133_s22, %s133_s22 }
  0x1f   : > { %p465_p6 = scmp.lt.s32.totalorder %s463_s9, %s456_s8 }
  0x20   : > { %p459_p9 = pnand %p457_p10, %p445_p13 }
  0x21   : > { %p466_p4 = por %p465_p6, %p464_p2 }
  0x22   : > { %p460_p1 = pneg %p459_p9 }
  0x24   : > { %p467_p8 = pnand %p466_p4, %p460_p1 }
  0x26   : > { %470 = shalt.err (!%p467_p8)
}
  0x27   : > { %387 = dma.hbm_to_vmem [thread:$0]  (!%p674_p11), %s859_s1, 16, %s133_s22, [#allocation6]  }
  0x28   : > { %s471_s23 = scalar_lea.hbm %s860_s2, 16 }
  0x29   : > { %p472_p9 = scmp.ne.s32.totalorder %s860_s2, %s471_s23  ;;  %p478_p4 = scmp.lt.u32.totalorder %s471_s23, %s860_s2 }
  0x2b   : > { %p474_p2 = pnand %p472_p9, %p445_p13 }
  0x2d   : > { %p475_p1 = pneg %p474_p2 }
  0x2f   : > { %p480_p6 = pnand %p478_p4, %p475_p1 }
  0x31   : > { %483 = shalt.err (!%p480_p6)
}
  0x32   : > { %s484_s22 = scalar_lea.vmem %s678_s24, 16  ;;  %s491_s5 = scalar_lea.vmem %s678_s24, 32 }
  0x33   : > { %p485_p8 = scmp.ne.s32.totalorder %s678_s24, %s484_s22  ;;  %p492_p3 = scmp.lt.s32.totalorder %s678_s24, %s678_s24 }
  0x34   : > { %p493_p5 = scmp.lt.s32.totalorder %s491_s5, %s484_s22 }
  0x35   : > { %p487_p12 = pnand %p485_p8, %p445_p13 }
  0x36   : > { %p494_p7 = por %p493_p5, %p492_p3 }
  0x37   : > { %p488_p0 = pneg %p487_p12 }
  0x39   : > { %p495_p10 = pnand %p494_p7, %p488_p0 }
  0x3b   : > { %498 = shalt.err (!%p495_p10)
}
  0x3c   : > { %390 = dma.hbm_to_vmem [thread:$0]  (!%p674_p11), %s860_s2, 16, %s678_s24, [#allocation6]  }
  0x3d   : > { %p25_p13 = scmp.eq.s32.totalorder %s24_s27, 0  ;;  %s27_s8 = sadd.s32 1, %s595_s14 }
  0x3e   : > { %p34_p9 = scmp.ne.s32.totalorder %s595_s14, %s591_s13  ;;  %p35_p2 = scmp.eq.s32.totalorder %s599_s15, 0 }
  0x3f   : > { %s741_s25 = scalar_select %p25_p13, %s595_s14, %s27_s8  }
  0x40   : > { %p36_p1 = por %p35_p2, %p34_p9  ;;  %p869_p4 = scmp.eq.s32.totalorder %s646_s16, 1 }
  0x41   : > { %p401_p8 = scmp.lt.s32.totalorder %s599_s15, 2  ;;  %s154_s10 = sand.u32 1, %s595_s14  }
  0x42   : > { %p745_p6 = por %p869_p4, %p34_p9  ;;  %s359_s11 = sshll.u32 %s154_s10, 3 }
  0x43   : > { %s360_s17 = sshll.u32 %s599_s15, 7  ;;  %s158_s27 = scalar_lea.vmem [#allocation2], %s359_s11 }
  0x44   : > { %s755_s24 = scalar_lea.hbm %s858_s0, %s360_s17  ;;  %s165_s28 = sshll.u32 %s158_s27, 4  ;;  %s757_s28 = int_to_ptr.vmem [resolvable:$true] %s165_s28 }
  0x45   : > { %p759_p11 = pnand %p401_p8, %p36_p1  ;;  %s155_s30 = scalar_lea.sflag [#allocation3], %s154_s10 }
  0x46   : > { %s499_s4 = scalar_lea.hbm %s755_s24, 128  ;;  %s504_s6 = scalar_lea.hbm %s858_s0, 256 }
  0x47   : > { %p500_p12 = scmp.ne.s32.totalorder %s755_s24, %s499_s4  ;;  %p501_p0 = pneg %p759_p11 }
  0x48   : > { %p505_p7 = scmp.lt.u32.totalorder %s755_s24, %s858_s0  ;;  %p506_p10 = scmp.lt.u32.totalorder %s504_s6, %s499_s4 }
  0x49   : > { %p502_p3 = pnand %p501_p0, %p500_p12  ;;  %p508_p9 = scmp.lt.u32.totalorder %s499_s4, %s755_s24 }
  0x4a   : > { %p507_p13 = por %p506_p10, %p505_p7 }
  0x4b   : > { %p503_p5 = pneg %p502_p3 }
  0x4c   : > { %p509_p2 = por %p508_p9, %p507_p13 }
  0x4e   : > { %p510_p1 = pnand %p509_p2, %p503_p5 }
  0x50   : > { %513 = shalt.err (!%p510_p1)
}
  0x51   : > { %s514_s10 = scalar_lea.vmem %s757_s28, 128  ;;  %s603_s11 = smov [#allocation2]  }
  0x52   : > { %p515_p4 = scmp.ne.s32.totalorder %s757_s28, %s514_s10  ;;  %s519_s17 = sshll.u32 %s603_s11, 4  ;;  %s520_s17 = int_to_ptr.vmem [resolvable:$false] %s519_s17 }
  0x53   : > { %s521_s21 = scalar_lea.vmem %s520_s17, 256  ;;  %p522_p3 = scmp.lt.s32.totalorder %s757_s28, %s520_s17 }
  0x54   : > { %p517_p8 = pnand %p515_p4, %p501_p0  ;;  %p523_p7 = scmp.lt.s32.totalorder %s521_s21, %s514_s10 }
  0x56   : > { %p518_p12 = pneg %p517_p8  ;;  %p524_p10 = por %p523_p7, %p522_p3 }
  0x58   : > { %p525_p13 = pnand %p524_p10, %p518_p12 }
  0x5a   : > { %528 = shalt.err (!%p525_p13)
}
  0x5b   : > { %394 = dma.hbm_to_vmem [thread:$0]  (!%p759_p11), %s755_s24, 128, %s757_s28, %s155_s30  }
  0x5c   : > { %p872_p5 = scmp.ne.s32.totalorder %s867_s20, 0 }
  0x5d   : > { %s791_s23 = sand.u32 (!%p872_p5), 1, %s591_s13   ;;  %p873_p0 = scmp.ne.s32.totalorder (!%p872_p5), %s865_s18, 0 }
  0x5e   : > { %174 = sbr.rel (%p872_p5) target bundleno = 448 (0x1c0), region = 32  ;;  %s362_s27 = sshll.u32 (!%p872_p5), %s791_s23, 3 }
  0x5f   : > { %s177_s4 = scalar_lea.sflag (!%p872_p5), [#allocation3], %s791_s23  ;;  %s180_s22 = scalar_lea.vmem (!%p872_p5), [#allocation2], %s362_s27 }
  0x65   : > { %574 = dma.done.wait (%p873_p0), %s177_s4, 128  }
  0x66   : > { %576 = vsyncadd (%p873_p0), %s177_s4, 4294967168  ;;  %p874_p11 = scmp.eq.s32.totalorder %s646_s16, 0 }
  0x68   : > { %578 = dma.done.wait (%p874_p11), [#allocation6], 32   ;;  %p875_p9 = pmov %p874_p11 }
  0x69   : > { %vm212_vm0 = vcmask 261120   ;;  %v211_v0 = vld [vmem:[%s180_s22] sm:$0xff]  ;;  %v366_v16 = vld [vmem:[#allocation5] ss:$0 sm:$0xff]  ;;  %v367_v18 = vld [vmem:[#allocation7] ss:$0 sm:$0xff] }
  0x6a   : > { %580 = vsyncadd (%p875_p9), [#allocation6], 4294967264  ;;  %v213_v1 = vsel %vm212_vm0, %v211_v0, 0.0  ;;  %s369_s18 = sshll.u32 %s646_s16, 7  ;;  %s210_s20 = scalar_lea.vmem [#allocation8], %s362_s27 }
  0x6b   : > { %214 = vadd.xlane.f32.xlu0 %v213_v1  ;;  %s265_s24 = sshll.u32 %s210_s20, 4  ;;  %s813_s30 = scalar_lea.hbm %s861_s3, %s369_s18  ;;  %s815_s24 = int_to_ptr.vmem [resolvable:$true] %s265_s24 }
  0x6c   : > { %s252_s5 = scalar_lea.sflag [#allocation4], %s791_s23  ;;  %s529_s6 = scalar_lea.vmem %s815_s24, 128 }
  0x6d   : > { %p530_p2 = scmp.ne.s32.totalorder %s815_s24, %s529_s6  ;;  %s604_s16 = smov [#allocation8]  }
  0x6e   : > { %s533_s7 = sshll.u32 %s604_s16, 4  ;;  %s534_s7 = int_to_ptr.vmem [resolvable:$false] %s533_s7 }
  0x6f   : > { %p531_p1 = pnand %p530_p2, %p745_p6  ;;  %s535_s8 = scalar_lea.vmem %s534_s7, 256 }
  0x70   : > { %p536_p8 = scmp.lt.s32.totalorder %s815_s24, %s534_s7  ;;  %p537_p12 = scmp.lt.s32.totalorder %s535_s8, %s529_s6 }
  0x71   : > { %p532_p4 = pneg %p531_p1 }
  0x72   : > { %p538_p3 = por %p537_p12, %p536_p8 }
  0x74   : > { %p539_p7 = pnand %p538_p3, %p532_p4 }
  0xf8   : > { %v215_v2 = vpop.xlane.xlu0 %214 }
  0xf9   : > { %v217_v3 = vmul.f32 0.03125, %v215_v2 }
  0xfb   : > { %v218_v4 = vsub.f32 %v211_v0, %v217_v3 }
  0xfd   : > { %v219_v5 = vmul.f32 %v218_v4, %v218_v4 }
  0xff   : > { %v220_v6 = vsel %vm212_vm0, %v219_v5, 0.0 }
 0x100   : > { %221 = vadd.xlane.f32.xlu0 %v220_v6 }
 0x18d   : > { %v222_v7 = vpop.xlane.xlu0 %221 }
 0x18e   : > { %v223_v8 = vmul.f32 0.032258064, %v222_v7 }
 0x190   : > { %439 = vrsqrt.f32 %v223_v8  ;;  %vm226_vm1 = vcmp.eq.f32.partialorder %v223_v8, inf  ;;  %v229_v11 = vand.u32 2147483648, %v223_v8  ;;  %vm228_vm2 = vcmp.eq.f32.partialorder %v223_v8, 0.0 }
 0x19a   : > { %v440_v9 = vpop.eup %439 }
 0x19b   : > { %v225_v10 = vmul.f32 %v440_v9, %v223_v8 }
 0x19d   : > { %v227_v12 = vsel %vm226_vm1, %v223_v8, %v225_v10 }
 0x19e   : > { %v230_v13 = vsel %vm228_vm2, %v229_v11, %v227_v12 }
 0x19f   : > { %v231_v14 = vadd.f32 0.001, %v230_v13 }
 0x1a1   : > { %441 = vrcp.f32 %v231_v14 }
 0x1ab   : > { %v442_v15 = vpop.eup %441 }
 0x1ac   : > { %v233_v17 = vmul.f32 %v442_v15, %v218_v4 }
 0x1ae   : > { %v241_v19 = vmul.f32 %v366_v16, %v233_v17 }
 0x1b0   : > { %v249_v20 = vadd.f32 %v367_v18, %v241_v19 }
 0x1b2   : > { %250 = vst.msk [vmem:[%s210_s20] sm:$0xff] %vm212_vm0, %v249_v20 }
 0x1b3   : > { %542 = shalt.err (!%p539_p7)
}
 0x1b4   : > { %s543_s10 = scalar_lea.hbm %s813_s30, 128  ;;  %s547_s21 = scalar_lea.hbm %s861_s3, 256 }
 0x1b5   : > { %p544_p10 = scmp.ne.s32.totalorder %s813_s30, %s543_s10  ;;  %p548_p0 = scmp.lt.u32.totalorder %s813_s30, %s861_s3 }
 0x1b6   : > { %p549_p11 = scmp.lt.u32.totalorder %s547_s21, %s543_s10  ;;  %p551_p2 = scmp.lt.u32.totalorder %s543_s10, %s813_s30 }
 0x1b7   : > { %p545_p13 = pnand %p544_p10, %p745_p6 }
 0x1b8   : > { %p550_p9 = por %p549_p11, %p548_p0 }
 0x1b9   : > { %p546_p5 = pneg %p545_p13 }
 0x1ba   : > { %p552_p1 = por %p551_p2, %p550_p9 }
 0x1bc   : > { %p553_p4 = pnand %p552_p1, %p546_p5 }
 0x1be   : > { %556 = shalt.err (!%p553_p4)
}
 0x1bf   : > { %382 = dma.vmem_to_hbm [thread:$0]  (%p745_p6), %s815_s24, 128, %s813_s30, %s252_s5  }
 0x1c0 PF: > { %s277_s4 = sand.u32 1, %s587_s12   ;;  %p876_p8 = scmp.ne.s32.totalorder %s866_s19, 0 }
 0x1c1   : > { %p877_p12 = scmp.ge.s32.totalorder %s599_s15, 2  ;;  %s278_s22 = scalar_lea.sflag [#allocation4], %s277_s4 }
 0x1c3   : > { %p396_p3 = pnand %p877_p12, %p876_p8 }
 0x1c5   : > { %582 = dma.done.wait (!%p396_p3), %s278_s22, 128  }
 0x1c6   : > { %584 = vsyncadd (!%p396_p3), %s278_s22, 4294967168  ;;  %p17_p7 = scmp.ge.s32.totalorder %s681_s26, 4   ;;  %s878_s12 = smov %s591_s13 }
 0x1c7   : > { %s879_s13 = smov %s595_s14  ;;  %s880_s14 = smov %s741_s25 }
 0x1c8   : > { %s881_s15 = smov %s681_s26  ;;  %19 = sbr.rel (!%p17_p7) target bundleno = 6 (0x6), region = 85 }
 0x1cf   :  { %283 = vsyncpa [#allocation3], 1 }
 0x1d0   :  { %285 = vsyncpa [#allocation3 + $0x1], 1 }
 0x1d1   :  { %286 = vsyncpa [#allocation6], 1 }
 0x1d2   :  { %287 = vsyncpa [#allocation4], 1 }
 0x1d3   :  { %289 = vsyncpa [#allocation4 + $0x1], 1 }

</bundles_post_ra>
